<compile_context>
chip_gen: v7x
topology: tpu7x:2x2x1
jax: 0.10.0
libtpu: 0.0.40
codegen_flags: <defaults>
</compile_context>

<pallas_src>
import functools
import math

import jax
import jax.numpy as jnp
from jax import lax
from jax.experimental import pallas as pl
from jax.experimental.pallas import tpu as pltpu

# Finite fill value for masked scores: avoids NaN (inf - inf) on fully-masked rows.
_MASK_FILL = -1e30


def _attn_kernel(q_ref, k_ref, v_ref, *rest, has_mask):
    if has_mask:
        m_ref, out_ref, attn_ref = rest
    else:
        out_ref, attn_ref = rest

    q = q_ref[0, 0]          # (tq, D)
    k = k_ref[0, 0]          # (Sk, D)
    v = v_ref[0, 0]          # (Sk, D)

    d_k = q.shape[-1]
    # Fold 1/sqrt(d_k) into the (tq, D) Q tile — cheaper than scaling (tq, Sk) scores.
    q = q * (1.0 / math.sqrt(d_k))

    # scores = Q @ K^T, contracting the head_dim axes directly (no explicit transpose).
    scores = lax.dot_general(
        q, k,
        dimension_numbers=(((1,), (1,)), ((), ())),
        preferred_element_type=jnp.float32,
    )                                                    # (tq, Sk) f32

    if has_mask:
        m = m_ref[0, 0]                                  # int32, broadcastable to (tq, Sk)
        scores = jnp.where(m == 0, _MASK_FILL, scores)

    # Softmax over keys; statistics stay f32, the divide runs on the EUP.
    row_max = jnp.max(scores, axis=-1, keepdims=True)
    exp = jnp.exp(scores - row_max)
    denom = jnp.sum(exp, axis=-1, keepdims=True)
    weights = exp * pl.reciprocal(denom, approx=True)

    attn_ref[0, 0] = weights.astype(attn_ref.dtype)
    out_ref[0, 0] = jnp.dot(
        weights.astype(v.dtype), v, preferred_element_type=jnp.float32
    ).astype(out_ref.dtype)


def _pick_q_tile(sq, sk):
    """Largest clean q-tile; shrink it if the (tq, Sk) f32 score tile would get big."""
    tq = sq
    for t in (512, 256, 128, 64, 32, 16, 8):
        if sq % t == 0:
            tq = t
            break
    # Keep per-step score/exp/attn tiles comfortably inside scoped VMEM on all TPU gens.
    while tq > 8 and sq % (tq // 2) == 0 and tq * sk * 4 > (4 << 20):
        tq //= 2
    return tq


def scaled_dot_product_attention(Q, K, V, mask=None):
    """Q: (B, H, Sq, D); K, V: (B, H, Sk, D); mask: broadcastable to (B, H, Sq, Sk) or None.

    Returns (output (B, H, Sq, D), attn_weights (B, H, Sq, Sk)) in Q's dtype."""
    B, H, Sq, D = Q.shape
    Sk = K.shape[2]

    tq = _pick_q_tile(Sq, Sk)
    num_q = Sq // tq
    grid = (B, H, num_q)

    q_spec = pl.BlockSpec((1, 1, tq, D), lambda b, h, qi: (b, h, qi, 0))
    kv_spec = pl.BlockSpec((1, 1, Sk, D), lambda b, h, qi: (b, h, 0, 0))
    out_spec = pl.BlockSpec((1, 1, tq, D), lambda b, h, qi: (b, h, qi, 0))
    attn_spec = pl.BlockSpec((1, 1, tq, Sk), lambda b, h, qi: (b, h, qi, 0))

    in_specs = [q_spec, kv_spec, kv_spec]
    inputs = [Q, K, V]
    has_mask = mask is not None

    if has_mask:
        m = jnp.asarray(mask)
        if m.ndim < 4:
            m = m.reshape((1,) * (4 - m.ndim) + m.shape)
        Bm, Hm, Mq, Mk = m.shape
        assert Bm in (1, B) and Hm in (1, H) and Mq in (1, Sq) and Mk in (1, Sk), (
            "mask must be broadcastable to (B, H, Sq, Sk)")
        # Keep the mask at its natural broadcastable shape — no HBM broadcast, no
        # per-(b,h) duplicate DMA.  `mask == 0` is what masked_fill keys on; evaluate
        # it once here and ship a compact int32 keep-mask.
        m = (m != 0).astype(jnp.int32)

        m_block = (1, 1, tq if Mq > 1 else 1, Mk)

        def m_index_map(b, h, qi):
            return (b if Bm > 1 else 0,
                    h if Hm > 1 else 0,
                    qi if Mq > 1 else 0,
                    0)

        in_specs.append(pl.BlockSpec(m_block, m_index_map))
        inputs.append(m)

    nbytes = lambda a: a.size * a.dtype.itemsize
    out_itemsize = jnp.dtype(Q.dtype).itemsize
    cost = pl.CostEstimate(
        flops=4 * B * H * Sq * Sk * D,                       # two matmuls
        transcendentals=B * H * Sq * Sk,                     # exp
        bytes_accessed=sum(nbytes(a) for a in inputs)
        + B * H * Sq * D * out_itemsize                      # output
        + B * H * Sq * Sk * out_itemsize,                    # attn weights
    )

    out, attn = pl.pallas_call(
        functools.partial(_attn_kernel, has_mask=has_mask),
        out_shape=(
            jax.ShapeDtypeStruct((B, H, Sq, D), Q.dtype),
            jax.ShapeDtypeStruct((B, H, Sq, Sk), Q.dtype),
        ),
        grid_spec=pltpu.PrefetchScalarGridSpec(
            num_scalar_prefetch=0,
            grid=grid,
            in_specs=in_specs,
            out_specs=[out_spec, attn_spec],
        ),
        compiler_params=pltpu.CompilerParams(
            dimension_semantics=("parallel", "parallel", "parallel"),
            vmem_limit_bytes=64 * 1024 * 1024,
        ),
        cost_estimate=cost,
    )(*inputs)
    return out, attn


def _reference(Q, K, V, mask=None):
    d_k = K.shape[-1]
    Qf = Q.astype(jnp.float32)
    Kf = K.astype(jnp.float32)
    Vf = V.astype(jnp.float32)
    scores = jnp.einsum("bhqd,bhkd->bhqk", Qf, Kf) / math.sqrt(d_k)
    if mask is not None:
        scores = jnp.where(mask == 0, -jnp.inf, scores)
    w = jax.nn.softmax(scores, axis=-1)
    out = jnp.einsum("bhqk,bhkd->bhqd", w, Vf)
    return out, w


if __name__ == "__main__":
    # --- small f32 test (shapes consistent with the PyTorch module) ---
    B, H, Sq, Sk, D = 2, 2, 8, 8, 32
    key = jax.random.PRNGKey(0)
    kq, kk, kv = jax.random.split(key, 3)
    Q = jax.random.normal(kq, (B, H, Sq, D), dtype=jnp.float32)
    K = jax.random.normal(kk, (B, H, Sk, D), dtype=jnp.float32)
    V = jax.random.normal(kv, (B, H, Sk, D), dtype=jnp.float32)

    # Causal mask at its natural broadcast shape (1, 1, Sq, Sk) — never broadcast in HBM.
    causal = jnp.tril(jnp.ones((Sq, Sk), dtype=jnp.float32))[None, None]

    out, attn = scaled_dot_product_attention(Q, K, V, causal)
    jax.block_until_ready((out, attn))
    ref_out, ref_attn = _reference(Q, K, V, causal)
    # Tolerance covers the approximate (EUP) reciprocal in the softmax normalization.
    assert jnp.allclose(out, ref_out, atol=5e-3, rtol=5e-3), "masked f32 output mismatch"
    assert jnp.allclose(attn, ref_attn, atol=5e-3, rtol=5e-3), "masked f32 attn mismatch"

    # --- mask=None path (no mask input / DMA at all) ---
    out2, attn2 = scaled_dot_product_attention(Q, K, V, None)
    jax.block_until_ready((out2, attn2))
    ref_out2, ref_attn2 = _reference(Q, K, V, None)
    assert jnp.allclose(out2, ref_out2, atol=5e-3, rtol=5e-3), "unmasked output mismatch"
    assert jnp.allclose(attn2, ref_attn2, atol=5e-3, rtol=5e-3), "unmasked attn mismatch"

    # --- bf16 path at MXU-friendly shapes (bf16 matmuls, f32 accumulation) ---
    B2, H2, S2, D2 = 1, 2, 128, 64
    k2 = jax.random.split(jax.random.PRNGKey(0), 3)
    Qb = jax.random.normal(k2[0], (B2, H2, S2, D2), dtype=jnp.bfloat16)
    Kb = jax.random.normal(k2[1], (B2, H2, S2, D2), dtype=jnp.bfloat16)
    Vb = jax.random.normal(k2[2], (B2, H2, S2, D2), dtype=jnp.bfloat16)
    causal_b = jnp.tril(jnp.ones((S2, S2), dtype=jnp.float32))[None, None]
    outb, attnb = scaled_dot_product_attention(Qb, Kb, Vb, causal_b)
    jax.block_until_ready((outb, attnb))
    ref_outb, ref_attnb = _reference(Qb, Kb, Vb, causal_b)
    assert jnp.allclose(outb.astype(jnp.float32), ref_outb, atol=5e-2, rtol=5e-2)
    assert jnp.allclose(attnb.astype(jnp.float32), ref_attnb, atol=5e-2, rtol=5e-2)

    print("KERNEL_OK")
</pallas_src>

<mosaic_0001>
module attributes {stable_mosaic.version = 11 : i64} {
  func.func @_attn_kernel(%arg0: i32, %arg1: i32, %arg2: i32, %arg3: memref<1x1x8x32xf32, #tpu.memory_space<vmem>>, %arg4: memref<1x1x8x32xf32, #tpu.memory_space<vmem>>, %arg5: memref<1x1x8x32xf32, #tpu.memory_space<vmem>>, %arg6: memref<1x1x8x8xi32, #tpu.memory_space<vmem>>, %arg7: memref<1x1x8x32xf32, #tpu.memory_space<vmem>>, %arg8: memref<1x1x8x8xf32, #tpu.memory_space<vmem>>) attributes {dimension_semantics = [#tpu.dimension_semantics<parallel>, #tpu.dimension_semantics<parallel>, #tpu.dimension_semantics<parallel>], iteration_bounds = array<i64: 2, 2, 1>, scalar_prefetch = 0 : i64, scratch_operands = 0 : i64, tpu.core_type = #tpu.core_type<tc>, window_params = [{transform_indices = @transform_0, window_bounds = array<i64: 1, 1, 8, 32>}, {transform_indices = @transform_1, window_bounds = array<i64: 1, 1, 8, 32>}, {transform_indices = @transform_2, window_bounds = array<i64: 1, 1, 8, 32>}, {transform_indices = @transform_3, window_bounds = array<i64: 1, 1, 8, 8>}, {transform_indices = @transform_4, window_bounds = array<i64: 1, 1, 8, 32>}, {transform_indices = @transform_5, window_bounds = array<i64: 1, 1, 8, 8>}]} {
    %c0 = arith.constant 0 : index
    %c0_0 = arith.constant 0 : index
    %c0_1 = arith.constant 0 : index
    %c0_2 = arith.constant 0 : index
    %0 = vector.load %arg3[%c0, %c0_0, %c0_1, %c0_2] : memref<1x1x8x32xf32, #tpu.memory_space<vmem>>, vector<1x1x8x32xf32>
    %1 = vector.shape_cast %0 : vector<1x1x8x32xf32> to vector<8x32xf32>
    %c0_3 = arith.constant 0 : index
    %c0_4 = arith.constant 0 : index
    %c0_5 = arith.constant 0 : index
    %c0_6 = arith.constant 0 : index
    %2 = vector.load %arg4[%c0_3, %c0_4, %c0_5, %c0_6] : memref<1x1x8x32xf32, #tpu.memory_space<vmem>>, vector<1x1x8x32xf32>
    %3 = vector.shape_cast %2 : vector<1x1x8x32xf32> to vector<8x32xf32>
    %c0_7 = arith.constant 0 : index
    %c0_8 = arith.constant 0 : index
    %c0_9 = arith.constant 0 : index
    %c0_10 = arith.constant 0 : index
    %4 = vector.load %arg5[%c0_7, %c0_8, %c0_9, %c0_10] : memref<1x1x8x32xf32, #tpu.memory_space<vmem>>, vector<1x1x8x32xf32>
    %5 = vector.shape_cast %4 : vector<1x1x8x32xf32> to vector<8x32xf32>
    %cst = arith.constant 0.176776692 : f32
    %6 = vector.broadcast %cst : f32 to vector<8x32xf32>
    %7 = arith.mulf %1, %6 : vector<8x32xf32>
    %cst_11 = arith.constant dense<0.000000e+00> : vector<8x8xf32>
    %8 = tpu.matmul %7, %3, %cst_11 {dimension_numbers = #tpu.dot_dimension_numbers<[1], [1], [0], [0], [0, 0, 1, 0], [], []>} : vector<8x32xf32>, vector<8x32xf32>, vector<8x8xf32> -> vector<8x8xf32>
    %c0_12 = arith.constant 0 : index
    %c0_13 = arith.constant 0 : index
    %c0_14 = arith.constant 0 : index
    %c0_15 = arith.constant 0 : index
    %9 = vector.load %arg6[%c0_12, %c0_13, %c0_14, %c0_15] : memref<1x1x8x8xi32, #tpu.memory_space<vmem>>, vector<1x1x8x8xi32>
    %10 = vector.shape_cast %9 : vector<1x1x8x8xi32> to vector<8x8xi32>
    %c0_i32 = arith.constant 0 : i32
    %11 = vector.broadcast %c0_i32 : i32 to vector<8x8xi32>
    %12 = arith.cmpi eq, %10, %11 : vector<8x8xi32>
    %cst_16 = arith.constant -1.000000e+30 : f32
    %13 = vector.broadcast %cst_16 : f32 to vector<8x8xf32>
    %14 = arith.select %12, %13, %8 : vector<8x8xi1>, vector<8x8xf32>
    %cst_17 = arith.constant dense<0xFF800000> : vector<8xf32>
    %15 = vector.multi_reduction <maximumf>, %14, %cst_17 [1] : vector<8x8xf32> to vector<8xf32>
    %16 = vector.shape_cast %15 : vector<8xf32> to vector<8x1xf32>
    %17 = vector.broadcast %16 : vector<8x1xf32> to vector<8x8xf32>
    %18 = arith.subf %14, %17 : vector<8x8xf32>
    %19 = math.exp %18 : vector<8x8xf32>
    %cst_18 = arith.constant dense<0.000000e+00> : vector<8xf32>
    %20 = vector.multi_reduction <add>, %19, %cst_18 [1] : vector<8x8xf32> to vector<8xf32>
    %21 = vector.shape_cast %20 : vector<8xf32> to vector<8x1xf32>
    %22 = tpu.reciprocal %21 {approx = true} : vector<8x1xf32> -> vector<8x1xf32>
    %23 = vector.broadcast %22 : vector<8x1xf32> to vector<8x8xf32>
    %24 = arith.mulf %19, %23 : vector<8x8xf32>
    %c0_19 = arith.constant 0 : index
    %c0_20 = arith.constant 0 : index
    %c0_21 = arith.constant 0 : index
    %c0_22 = arith.constant 0 : index
    %25 = vector.load %arg8[%c0_19, %c0_20, %c0_21, %c0_22] : memref<1x1x8x8xf32, #tpu.memory_space<vmem>>, vector<1x1x8x8xf32>
    %26 = vector.shape_cast %25 : vector<1x1x8x8xf32> to vector<8x8xf32>
    %27 = vector.shape_cast %24 : vector<8x8xf32> to vector<1x1x8x8xf32>
    tpu.vector_store %arg8[%c0_19, %c0_20, %c0_21, %c0_22], %27 {strides = array<i32>} : memref<1x1x8x8xf32, #tpu.memory_space<vmem>>, vector<1x1x8x8xf32>,
    %cst_23 = arith.constant dense<0.000000e+00> : vector<8x32xf32>
    %28 = tpu.matmul %24, %5, %cst_23 {dimension_numbers = #tpu.dot_dimension_numbers<[1], [0], [0], [1], [0, 0, 1, 1], [], []>} : vector<8x8xf32>, vector<8x32xf32>, vector<8x32xf32> -> vector<8x32xf32>
    %c0_24 = arith.constant 0 : index
    %c0_25 = arith.constant 0 : index
    %c0_26 = arith.constant 0 : index
    %c0_27 = arith.constant 0 : index
    %29 = vector.load %arg7[%c0_24, %c0_25, %c0_26, %c0_27] : memref<1x1x8x32xf32, #tpu.memory_space<vmem>>, vector<1x1x8x32xf32>
    %30 = vector.shape_cast %29 : vector<1x1x8x32xf32> to vector<8x32xf32>
    %31 = vector.shape_cast %28 : vector<8x32xf32> to vector<1x1x8x32xf32>
    tpu.vector_store %arg7[%c0_24, %c0_25, %c0_26, %c0_27], %31 {strides = array<i32>} : memref<1x1x8x32xf32, #tpu.memory_space<vmem>>, vector<1x1x8x32xf32>,
    return
  }
  func.func @transform_0(%arg0: i32, %arg1: i32, %arg2: i32) -> (i32, i32, i32, i32) {
    %c0_i32 = arith.constant 0 : i32
    %c0_i32_0 = arith.constant 0 : i32
    return %arg0, %arg1, %arg2, %c0_i32 : i32, i32, i32, i32
  }
  func.func @transform_1(%arg0: i32, %arg1: i32, %arg2: i32) -> (i32, i32, i32, i32) {
    %c0_i32 = arith.constant 0 : i32
    %c0_i32_0 = arith.constant 0 : i32
    %c0_i32_1 = arith.constant 0 : i32
    return %arg0, %arg1, %c0_i32, %c0_i32_0 : i32, i32, i32, i32
  }
  func.func @transform_2(%arg0: i32, %arg1: i32, %arg2: i32) -> (i32, i32, i32, i32) {
    %c0_i32 = arith.constant 0 : i32
    %c0_i32_0 = arith.constant 0 : i32
    %c0_i32_1 = arith.constant 0 : i32
    return %arg0, %arg1, %c0_i32, %c0_i32_0 : i32, i32, i32, i32
  }
  func.func @transform_3(%arg0: i32, %arg1: i32, %arg2: i32) -> (i32, i32, i32, i32) {
    %c0_i32 = arith.constant 0 : i32
    %c0_i32_0 = arith.constant 0 : i32
    %c0_i32_1 = arith.constant 0 : i32
    %c0_i32_2 = arith.constant 0 : i32
    return %c0_i32, %c0_i32_0, %arg2, %c0_i32_1 : i32, i32, i32, i32
  }
  func.func @transform_4(%arg0: i32, %arg1: i32, %arg2: i32) -> (i32, i32, i32, i32) {
    %c0_i32 = arith.constant 0 : i32
    %c0_i32_0 = arith.constant 0 : i32
    return %arg0, %arg1, %arg2, %c0_i32 : i32, i32, i32, i32
  }
  func.func @transform_5(%arg0: i32, %arg1: i32, %arg2: i32) -> (i32, i32, i32, i32) {
    %c0_i32 = arith.constant 0 : i32
    %c0_i32_0 = arith.constant 0 : i32
    return %arg0, %arg1, %arg2, %c0_i32 : i32, i32, i32, i32
  }
}

</mosaic_0001>

<bundles_post_ra>
// kernel: tpu_custom_call.1
= control target key start
LH: loop header
LB: loop body
LE: loop exit
PB: predicated region body
PF: predicated region fallthrough
CT: control target
= control target key end

     0   :  { %s1580_s0 = inlined_call_operand.hbm [shape: f32[2,2,8,32], index: 0, kind: input, shape index: {}]   ;;  %s1581_s1 = inlined_call_operand.hbm [shape: f32[2,2,8,32], index: 1, kind: input, shape index: {}]   ;;  %s1582_s2 = inlined_call_operand.hbm [shape: f32[2,2,8,32], index: 2, kind: input, shape index: {}]   ;;  %s1583_s3 = inlined_call_operand.hbm [shape: s32[1,1,8,8], index: 3, kind: input, shape index: {}]   ;;  %s1584_s4 = inlined_call_operand.hbm [shape: f32[2,2,8,32], index: 4, kind: output, shape index: {0}]   ;;  %s1585_s5 = inlined_call_operand.hbm [shape: f32[2,2,8,8], index: 5, kind: output, shape index: {1}]  }
   0x1   :  { %1606 = sst [smem:[#allocation27_spill]] %s1581_s1 }
   0x2   :  { %11 = vsyncpa [#allocation3], 0 }
   0x3   :  { %13 = vsyncpa [#allocation3 + $0x1], 0 }
   0x4   :  { %14 = vsyncpa [#allocation6], 0 }
   0x5   :  { %16 = vsyncpa [#allocation6 + $0x1], 0 }
   0x6   :  { %17 = vsyncpa [#allocation9], 0 }
   0x7   :  { %18 = vsyncpa [#allocation4], 0 }
   0x8   :  { %20 = vsyncpa [#allocation4 + $0x1], 0 }
   0x9   :  { %21 = vsyncpa [#allocation12], 0 }
   0xa   :  { %23 = vsyncpa [#allocation12 + $0x1], 0  ;;  %s1229_s18 = smov 0   ;;  %s1231_s19 = smov 0  }
   0xb   :  { %s1233_s20 = smov 0   ;;  %s1235_s21 = smov 0  }
   0xc   :  { %s1237_s22 = smov 0   ;;  %s1239_s23 = smov 0  }
   0xd   :  { %s1241_s24 = smov 0   ;;  %s1243_s25 = smov 0  }
   0xe LB: > { %1607 = sst [smem:[#allocation18_spill]] %s1161_s18  ;;  %s44_s26 = sadd.s32 1, %s1181_s23  ;;  %s1189_s25 = sphi %s1243_s25, %s29_s25   ;;  %s1185_s24 = sphi %s1241_s24, %s1644_s24   ;;  %s1181_s23 = sphi %s1239_s23, %s1643_s23   ;;  %s1177_s22 = sphi %s1237_s22, %s1642_s22   ;;  %s1173_s21 = sphi %s1235_s21, %s1641_s21   ;;  %s1169_s20 = sphi %s1233_s20, %s1640_s20   ;;  %s1165_s19 = sphi %s1231_s19, %s1646_s19   ;;  %s1161_s18 = sphi %s1229_s18, %s1645_s18  }
   0xf   : > { %1608 = sst [smem:[#allocation19_spill]] %s1169_s20  ;;  %s48_s27 = sadd.s32 1, %s1185_s24 }
  0x10   : > { %1609 = sst [smem:[#allocation20_spill]] %s1181_s23  ;;  %p46_p0 = scmp.ge.s32.totalorder %s44_s26, 2 }
  0x11   : > { %1610 = sst [smem:[#allocation21_spill]] %s1185_s24  ;;  %s59_s28 = sadd.s32 1, %s1169_s20 }
  0x12   : > { %1611 = sst [smem:[#allocation22_spill]] %s1189_s25  ;;  %p1587_p1 = scmp.ne.s32.totalorder %s1169_s20, %s1165_s19 }
  0x13   : > { %p67_p2 = scmp.eq.s32.totalorder %s1189_s25, 0  ;;  %s1648_s26 = smov (%p46_p0, %s44_s26), 0 }
  0x14   : > { %1612 = sst [smem:[#allocation23_spill]] %s1648_s26  ;;  %s1650_s27 = smov (!%p46_p0, %s48_s27), %s1185_s24 }
  0x15   : > { %s53_s29 = ssub.s32 %s1181_s23, %s1648_s26  ;;  %p68_p3 = por %p67_p2, %p1587_p1 }
  0x16   : > { %p50_p4 = scmp.ge.s32.totalorder %s1650_s27, 2  ;;  %p859_p5 = scmp.lt.s32.totalorder %s1189_s25, 4 }
  0x17   : > { %s1586_s30 = sand.u32 1, %s1169_s20   ;;  %s783_s7 = sshll.u32 %s1185_s24, 1 }
  0x18   : > { %s1652_s27 = smov (%p50_p4, %s1650_s27), 0  ;;  %s1289_s6 = sshll.u32 %s1586_s30, 3 }
  0x19   : > { %1613 = sst [smem:[#allocation24_spill]] %s1652_s27  ;;  %s52_s8 = ssub.s32 %s1185_s24, %s1652_s27 }
  0x1a   : > { %s261_s9 = sadd.s32 %s1181_s23, %s783_s7  ;;  %s54_s10 = sor.u32 %s53_s29, %s52_s8 }
  0x1b   : > { %s1295_s11 = sshll.u32 %s261_s9, 7  ;;  %p57_p6 = scmp.eq.s32.totalorder %s54_s10, 0 }
  0x1c   : > { %p1297_p7 = pnand %p859_p5, %p68_p3  ;;  %s272_s13 = sand.u32 1, %s1189_s25  }
  0x1d   : > { %s1303_s14 = scalar_select %p57_p6, %s1169_s20, %s59_s28  }
  0x1e   : > { %s1614_s12 = scalar_select %p1297_p7, 1, 0 }
  0x1f   : > { %1615 = sst [smem:[#allocation25_spill]] %s1303_s14  ;;  %s1616_s1 = sld [smem:[#allocation27_spill]] }
  0x20   : > { %s276_s29 = scalar_lea.vmem [#allocation5], %s1289_s6  ;;  %s1314_s8 = scalar_lea.sflag [#allocation6], %s272_s13 }
  0x21   : > { %s285_s7 = sshll.u32 %s276_s29, 4  ;;  %p1320_p9 = pneg %p1297_p7  ;;  %s1312_s7 = int_to_ptr.vmem [resolvable:$true] %s285_s7 }
  0x23   : > { %s1617_s28 = scalar_select %p1320_p9, 1, 0 }
  0x25   : > { %s1309_s17 = scalar_lea.hbm %s1616_s1, %s1295_s11  ;;  %s938_s16 = scalar_lea.hbm %s1616_s1, 512 }
  0x26   : > { %s933_s9 = scalar_lea.hbm %s1309_s17, 128  ;;  %p939_p12 = scmp.lt.u32.totalorder %s1309_s17, %s1616_s1 }
  0x27   : > { %p934_p8 = scmp.ne.s32.totalorder %s1309_s17, %s933_s9  ;;  %p940_p13 = scmp.lt.u32.totalorder %s938_s16, %s933_s9 }
  0x28   : > { %p942_p2 = scmp.lt.u32.totalorder %s933_s9, %s1309_s17 }
  0x29   : > { %p936_p10 = pnand %p1320_p9, %p934_p8  ;;  %p941_p0 = por %p940_p13, %p939_p12 }
  0x2b   : > { %p937_p11 = pneg %p936_p10  ;;  %p943_p3 = por %p942_p2, %p941_p0 }
  0x2d   : > { %p944_p4 = pnand %p943_p3, %p937_p11 }
  0x2f   : > { %947 = shalt.err (!%p944_p4)
}
  0x30   : > { %s948_s13 = scalar_lea.vmem %s1312_s7, 128  ;;  %s1191_s10 = smov [#allocation5]  }
  0x31   : > { %p949_p5 = scmp.ne.s32.totalorder %s1312_s7, %s948_s13  ;;  %s953_s15 = sshll.u32 %s1191_s10, 4  ;;  %s954_s15 = int_to_ptr.vmem [resolvable:$false] %s953_s15 }
  0x32   : > { %s955_s30 = scalar_lea.vmem %s954_s15, 256  ;;  %p956_p10 = scmp.lt.s32.totalorder %s1312_s7, %s954_s15 }
  0x33   : > { %p951_p6 = pnand %p949_p5, %p1320_p9  ;;  %p957_p1 = scmp.lt.s32.totalorder %s955_s30, %s948_s13 }
  0x35   : > { %p952_p8 = pneg %p951_p6  ;;  %p958_p12 = por %p957_p1, %p956_p10 }
  0x37   : > { %p959_p13 = pnand %p958_p12, %p952_p8 }
  0x39   : > { %962 = shalt.err (!%p959_p13)
}
  0x3a   : > { %847 = dma.hbm_to_vmem [thread:$0]  (!%p1297_p7), %s1309_s17, 128, %s1312_s7, %s1314_s8  }
  0x3b   : > { %s1345_s9 = sadd.s32 4294967295, %s1189_s25   ;;  %s778_s16 = sadd.s32 4294967294, %s1189_s25  }
  0x3c   : > { %p72_p1 = scmp.ne.s32.totalorder %s1165_s19, %s1161_s18  ;;  %p1596_p11 = scmp.eq.s32.totalorder %s1345_s9, 0 }
  0x3d   : > { %p182_p0 = scmp.eq.s32.totalorder %s1345_s9, 3  ;;  %p188_p2 = scmp.eq.s32.totalorder %s778_s16, 3 }
  0x3e   : > { %p779_p3 = scmp.ge.s32.totalorder %s1189_s25, 1  ;;  %p1355_p4 = por %p1596_p11, %p72_p1 }
  0x3f   : > { %p1619_p5 = scmp.ne.s32.totalorder %s1169_s20, %s1165_s19  ;;  %p1366_p8 = por %p188_p2, %p72_p1 }
  0x40   : > { %s1618_s29 = scalar_select %p1355_p4, 1, 0 }
  0x41   : > { %p1362_p6 = por %p182_p0, %p1619_p5  ;;  %p225_p10 = scmp.lt.s32.totalorder %s1189_s25, 5 }
  0x42   : > { %s1621_s7 = scalar_select %p1366_p8, 1, 0 }
  0x43   : > { %s1620_s17 = scalar_select %p1362_p6, 1, 0 }
  0x44   : > { %1622 = sst [smem:[#allocation26_spill]] %s1621_s7  ;;  %p1371_p12 = pnand %p779_p3, %p225_p10 }
  0x45   : > { %s1192_s10 = smov [#allocation8]   ;;  %s1383_s1 = scalar_lea.hbm %s1580_s0, %s1295_s11 }
  0x46   : > { %s1623_s13 = scalar_select %p1371_p12, 1, 0 }
  0x47   : > { %s240_s15 = sshll.u32 %s1192_s10, 4  ;;  %p837_p13 = pneg %p1371_p12  ;;  %s1375_s15 = int_to_ptr.vmem [resolvable:$true] %s240_s15 }
  0x48   : > { %s255_s27 = scalar_lea.vmem [#allocation2], %s1289_s6  ;;  %s1625_s10 = sand.u32 1, %s1169_s20  }
  0x49   : > { %s265_s26 = sshll.u32 %s255_s27, 4  ;;  %p1388_p1 = pnand %p837_p13, %p1596_p11  ;;  %s266_s26 = int_to_ptr.vmem [resolvable:$true] %s265_s26 }
  0x4a   : > { %s252_s23 = scalar_lea.sflag [#allocation3], %s1625_s10  ;;  %s963_s14 = scalar_lea.hbm %s1383_s1, 128 }
  0x4b   : > { %s1624_s24 = scalar_select %p1388_p1, 1, 0 }
  0x4c   : > { %p964_p0 = scmp.ne.s32.totalorder %s1383_s1, %s963_s14  ;;  %s968_s7 = scalar_lea.hbm %s1580_s0, 512 }
  0x4d   : > { %p969_p5 = scmp.lt.u32.totalorder %s1383_s1, %s1580_s0  ;;  %p970_p10 = scmp.lt.u32.totalorder %s968_s7, %s963_s14 }
  0x4e   : > { %p966_p2 = pnand %p964_p0, %p1320_p9  ;;  %p972_p11 = scmp.lt.u32.totalorder %s963_s14, %s1383_s1 }
  0x4f   : > { %p971_p13 = por %p970_p10, %p969_p5 }
  0x50   : > { %p967_p3 = pneg %p966_p2 }
  0x51   : > { %p973_p8 = por %p972_p11, %p971_p13 }
  0x53   : > { %p974_p6 = pnand %p973_p8, %p967_p3 }
  0x55   : > { %977 = shalt.err (!%p974_p6)
}
  0x56   : > { %s978_s27 = scalar_lea.vmem %s266_s26, 128  ;;  %s1193_s10 = smov [#allocation2]  }
  0x57   : > { %p979_p4 = scmp.ne.s32.totalorder %s266_s26, %s978_s27  ;;  %s983_s20 = sshll.u32 %s1193_s10, 4  ;;  %s984_s20 = int_to_ptr.vmem [resolvable:$false] %s983_s20 }
  0x58   : > { %s985_s30 = scalar_lea.vmem %s984_s20, 256  ;;  %p986_p12 = scmp.lt.s32.totalorder %s266_s26, %s984_s20 }
  0x59   : > { %p981_p0 = pnand %p979_p4, %p1320_p9  ;;  %p987_p1 = scmp.lt.s32.totalorder %s985_s30, %s978_s27 }
  0x5b   : > { %p982_p2 = pneg %p981_p0  ;;  %p988_p7 = por %p987_p1, %p986_p12 }
  0x5d   : > { %p989_p5 = pnand %p988_p7, %p982_p2 }
  0x5f   : > { %992 = shalt.err (!%p989_p5)
}
  0x60   : > { %p1626_p10 = scmp.ne.s32.totalorder %s1614_s12, 0  ;;  %s993_s14 = scalar_lea.hbm %s1583_s3, 128 }
  0x61   : > { %p994_p11 = scmp.ne.s32.totalorder %s1583_s3, %s993_s14  ;;  %p1627_p4 = scmp.ne.s32.totalorder %s1624_s24, 0 }
  0x62   : > { %844 = dma.hbm_to_vmem [thread:$0]  (!%p1626_p10), %s1383_s1, 128, %s266_s26, %s252_s23  }
  0x63   : > { %p995_p6 = pneg %p1627_p4  ;;  %p1000_p7 = scmp.lt.u32.totalorder %s993_s14, %s1583_s3 }
  0x65   : > { %p996_p8 = pnand %p995_p6, %p994_p11 }
  0x67   : > { %p997_p3 = pneg %p996_p8 }
  0x69   : > { %p1002_p12 = pnand %p1000_p7, %p997_p3 }
  0x6b   : > { %1005 = shalt.err (!%p1002_p12)
}
  0x6c   : > { %s1006_s1 = scalar_lea.vmem %s1375_s15, 128  ;;  %p1014_p2 = scmp.lt.s32.totalorder %s1375_s15, %s1375_s15 }
  0x6d   : > { %p1007_p1 = scmp.ne.s32.totalorder %s1375_s15, %s1006_s1  ;;  %p1015_p5 = scmp.lt.s32.totalorder %s1006_s1, %s1006_s1 }
  0x6f   : > { %p1009_p13 = pnand %p1007_p1, %p995_p6  ;;  %p1016_p10 = por %p1015_p5, %p1014_p2 }
  0x71   : > { %p1010_p0 = pneg %p1009_p13 }
  0x73   : > { %p1017_p9 = pnand %p1016_p10, %p1010_p0 }
  0x75   : > { %1020 = shalt.err (!%p1017_p9)
}
  0x76   : > { %840 = dma.hbm_to_vmem [thread:$0]  (!%p1627_p4), %s1583_s3, 128, %s1375_s15, [#allocation9]  }
  0x77   : > { %s1436_s18 = scalar_lea.hbm %s1582_s2, %s1295_s11  ;;  %s296_s25 = scalar_lea.vmem [#allocation7], %s1289_s6 }
  0x78   : > { %s305_s14 = sshll.u32 %s296_s25, 4  ;;  %s1021_s24 = scalar_lea.hbm %s1436_s18, 128  ;;  %s306_s14 = int_to_ptr.vmem [resolvable:$true] %s305_s14 }
  0x79   : > { %p1022_p9 = scmp.ne.s32.totalorder %s1436_s18, %s1021_s24  ;;  %p1628_p10 = scmp.ne.s32.totalorder %s1617_s28, 0 }
  0x7a   : > { %s1026_s15 = scalar_lea.hbm %s1582_s2, 512  ;;  %p1027_p4 = scmp.lt.u32.totalorder %s1436_s18, %s1582_s2 }
  0x7b   : > { %p1024_p11 = pnand %p1022_p9, %p1628_p10  ;;  %p1028_p8 = scmp.lt.u32.totalorder %s1026_s15, %s1021_s24 }
  0x7c   : > { %p1030_p7 = scmp.lt.u32.totalorder %s1021_s24, %s1436_s18 }
  0x7d   : > { %p1025_p6 = pneg %p1024_p11  ;;  %p1029_p3 = por %p1028_p8, %p1027_p4 }
  0x7f   : > { %p1031_p12 = por %p1030_p7, %p1029_p3 }
  0x81   : > { %p1032_p1 = pnand %p1031_p12, %p1025_p6 }
  0x83   : > { %1035 = shalt.err (!%p1032_p1)
}
  0x84   : > { %s1036_s6 = scalar_lea.vmem %s306_s14, 128  ;;  %s1194_s11 = smov [#allocation7]  }
  0x85   : > { %p1037_p13 = scmp.ne.s32.totalorder %s306_s14, %s1036_s6  ;;  %s1041_s1 = sshll.u32 %s1194_s11, 4  ;;  %s1042_s1 = int_to_ptr.vmem [resolvable:$false] %s1041_s1 }
  0x86   : > { %s1043_s23 = scalar_lea.vmem %s1042_s1, 256  ;;  %p1044_p5 = scmp.lt.s32.totalorder %s306_s14, %s1042_s1 }
  0x87   : > { %p1039_p0 = pnand %p1037_p13, %p1628_p10  ;;  %p1045_p9 = scmp.lt.s32.totalorder %s1043_s23, %s1036_s6 }
  0x89   : > { %p1040_p2 = pneg %p1039_p0  ;;  %p1046_p11 = por %p1045_p9, %p1044_p5 }
  0x8b   : > { %p1047_p4 = pnand %p1046_p11, %p1040_p2 }
  0x8d   : > { %1050 = shalt.err (!%p1047_p4)
}
  0x8e   : > { %p1629_p8 = scmp.ne.s32.totalorder %s1614_s12, 0  ;;  %p1630_p6 = scmp.ne.s32.totalorder %s1623_s13, 0 }
  0x8f   : > { %s1460_s28 = sand.u32 (!%p1630_p6), 1, %s1165_s19   ;;  %p1631_p10 = scmp.ne.s32.totalorder (!%p1630_p6), %s1618_s29, 0 }
  0x90   : > { %850 = dma.hbm_to_vmem [thread:$0]  (!%p1629_p8), %s1436_s18, 128, %s306_s14, %s1314_s8  }
  0x91   : > { %314 = sbr.rel (%p1630_p6) target bundleno = 918 (0x396), region = 36  ;;  %s1463_s26 = sshll.u32 (!%p1630_p6), %s1460_s28, 3 }
  0x92   : > { %s317_s10 = scalar_lea.sflag (!%p1630_p6), [#allocation3], %s1460_s28  ;;  %s320_s30 = scalar_lea.vmem (!%p1630_p6), [#allocation2], %s1463_s26 }
  0x98   : > { %1140 = dma.done.wait (%p1631_p10), %s317_s10, 128  }
  0x99   : > { %1142 = vsyncadd (%p1631_p10), %s317_s10, 4294967168  ;;  %s325_s12 = sand.u32 1, %s1345_s9   ;;  %s329_s13 = scalar_lea.vmem [#allocation5], %s1463_s26 }
  0x9a   : > { %s326_s8 = scalar_lea.sflag [#allocation6], %s325_s12 }
  0x9b   : > { %1144 = dma.done.wait (%p1631_p10), %s326_s8, 256  }
  0x9c   : > { %1146 = vsyncadd (%p1631_p10), %s326_s8, 4294967040  ;;  %s338_s18 = scalar_lea.vmem [#allocation7], %s1463_s26  ;;  %p1632_p3 = scmp.eq.s32.totalorder %s1345_s9, 0 }
  0x9e   : > { %1148 = dma.done.wait (%p1632_p3), [#allocation9], 128   ;;  %p1633_p7 = pmov %p1632_p3 }
  0x9f   : > { %v1195_v0 = vmov 0.0   ;;  %vm1196_vm0 = vmmov 0   ;;  %vm388_vm1 = vcmask 261120   ;;  %v385_v1 = vld [vmem:[%s329_s13] sm:$0xff]  ;;  %v384_v2 = vld [vmem:[%s320_s30] sm:$0xff]  ;;  %vm468_vm3 = vcmask 64512  }
  0xa0   : > { %1150 = vsyncadd (%p1633_p7), [#allocation9], 4294967168  ;;  %813 = vmatprep.subr.mxu0 %v1195_v0  ;;  %815 = vmatprep.mubr.msk.f32.mxu0 %vm1196_vm0, %v1195_v0  ;;  %v387_v3 = vmul.f32 0.17677669, %v384_v2  ;;  %v465_v4 = vld [vmem:[#allocation8] sm:$0xff]  ;;  %v386_v14 = vld [vmem:[%s338_s18] sm:$0xff] }
  0xa1   : > { %818 = vmatprep.subr.mxu1 %v1195_v0  ;;  %820 = vmatprep.mubr.msk.f32.mxu1 %vm1196_vm0, %v1195_v0  ;;  %vm466_vm2 = vcmp.eq.s32.totalorder %v465_v4, 0  ;;  %s383_s9 = scalar_lea.vmem [#allocation11], %s1463_s26  ;;  %s803_s29 = sshll.u32 %s1177_s22, 1 }
  0xa2   : > { %814 = vmatpush3.xpose.msk.msra.mxu0 %vm388_vm1, %v385_v1  ;;  %819 = vmatpush3.msra.mxu1 %v386_v14  ;;  %s1491_s25 = sadd.s32 %s1173_s21, %s803_s29  ;;  %s593_s15 = sshll.u32 %s383_s9, 4  ;;  %s594_s15 = int_to_ptr.vmem [resolvable:$true] %s593_s15 }
  0xa3   : > { %s804_s14 = sshll.u32 %s1491_s25, 7  ;;  %s561_s20 = scalar_lea.sflag [#allocation12], %s1460_s28 }
  0xa4   : > { %s1499_s16 = scalar_lea.hbm %s1585_s5, %s804_s14  ;;  %s1051_s27 = scalar_lea.vmem %s594_s15, 128 }
  0xa5   : > { %816 = vmatmul.mubr.msk.f32.vlgmr.msra.gmra.mrb[0].mxu0 %vm388_vm1, %v387_v3  ;;  %p1052_p12 = scmp.ne.s32.totalorder %s594_s15, %s1051_s27  ;;  %p1634_p1 = scmp.ne.s32.totalorder %s1620_s17, 0 }
  0xa6   : > { %s1197_s22 = smov [#allocation11]  }
  0xa7   : > { %p1053_p13 = pnand %p1052_p12, %p1634_p1  ;;  %s1055_s21 = sshll.u32 %s1197_s22, 4  ;;  %s1056_s21 = int_to_ptr.vmem [resolvable:$false] %s1055_s21 }
  0xa8   : > { %s1057_s6 = scalar_lea.vmem %s1056_s21, 256  ;;  %p1058_p2 = scmp.lt.s32.totalorder %s594_s15, %s1056_s21 }
  0xa9   : > { %p1054_p0 = pneg %p1053_p13  ;;  %p1059_p5 = scmp.lt.s32.totalorder %s1057_s6, %s1051_s27 }
  0xab   : > { %p1060_p9 = por %p1059_p5, %p1058_p2 }
  0xad   : > { %p1061_p11 = pnand %p1060_p9, %p1054_p0 }
 0x178   : > { %v461_v5 = vpop.f32.mrb[0].mxu0 }
 0x179   : > { %v467_v6 = vsel %vm466_vm2, -1e+30, %v461_v5  ;;  %v817_v7 = vpop.f32.mrb[1].mxu0 }
 0x17a   : > { %v469_v8 = vsel %vm468_vm3, %v467_v6, -inf }
 0x17b   : > { %470 = vmax.xlane.f32.xlu0 %v469_v8 }
 0x208   : > { %v471_v9 = vpop.xlane.xlu0 %470 }
 0x209   : > { %v472_v10 = vsub.f32 %v467_v6, %v471_v9 }
 0x20b   : > { %v473_v11 = vmul.f32 1.442695, %v472_v10 }
 0x20d   : > { %929 = vpow2.f32 %v473_v11 }
 0x217   : > { %v930_v12 = vpop.eup %929 }
 0x218   : > { %v475_v13 = vsel %vm468_vm3, %v930_v12, 0.0 }
 0x219   : > { %476 = vadd.xlane.f32.xlu0 %v475_v13 }
 0x2a6   : > { %v477_v15 = vpop.xlane.xlu0 %476 }
 0x2a7   : > { %931 = vrcp.f32 %v477_v15 }
 0x2b1   : > { %v932_v16 = vpop.eup %931 }
 0x2b2   : > { %v479_v17 = vmul.f32 %v932_v16, %v930_v12 }
 0x2b4   : > { %821 = vmatmul.mubr.msk.f32.vlgmr.msra.gmra.mrb[0].mxu1 %vm468_vm3, %v479_v17  ;;  %480 = vst.msk [vmem:[%s383_s9] sm:$0xff] %vm468_vm3, %v479_v17 }
 0x2b5   : > { %1064 = shalt.err (!%p1061_p11)
}
 0x2b6   : > { %s1065_s11 = scalar_lea.hbm %s1499_s16, 128  ;;  %s1069_s10 = scalar_lea.hbm %s1585_s5, 512 }
 0x2b7   : > { %p1066_p4 = scmp.ne.s32.totalorder %s1499_s16, %s1065_s11  ;;  %p1070_p10 = scmp.lt.u32.totalorder %s1499_s16, %s1585_s5 }
 0x2b8   : > { %p1071_p3 = scmp.lt.u32.totalorder %s1069_s10, %s1065_s11  ;;  %p1073_p12 = scmp.lt.u32.totalorder %s1065_s11, %s1499_s16 }
 0x2b9   : > { %p1067_p8 = pnand %p1066_p4, %p1634_p1 }
 0x2ba   : > { %p1072_p7 = por %p1071_p3, %p1070_p10 }
 0x2bb   : > { %p1068_p6 = pneg %p1067_p8 }
 0x2bc   : > { %p1074_p13 = por %p1073_p12, %p1072_p7 }
 0x2be   : > { %p1075_p0 = pnand %p1074_p13, %p1068_p6 }
 0x2c0   : > { %1078 = shalt.err (!%p1075_p0)
}
 0x2c1   : > { %834 = dma.vmem_to_hbm [thread:$0]  (%p1634_p1), %s594_s15, 128, %s1499_s16, %s561_s20  }
 0x2c2   : > { %s376_s8 = scalar_lea.vmem [#allocation10], %s1463_s26  ;;  %s1525_s29 = scalar_lea.hbm %s1584_s4, %s804_s14 }
 0x2c3   : > { %s577_s13 = sshll.u32 %s376_s8, 4  ;;  %s556_s24 = scalar_lea.sflag [#allocation4], %s1460_s28  ;;  %s1527_s13 = int_to_ptr.vmem [resolvable:$true] %s577_s13 }
 0x2c4   : > { %s1079_s7 = scalar_lea.vmem %s1527_s13, 128  ;;  %s1198_s26 = smov [#allocation10]  }
 0x2c5   : > { %p1080_p2 = scmp.ne.s32.totalorder %s1527_s13, %s1079_s7  ;;  %s1083_s25 = sshll.u32 %s1198_s26, 4  ;;  %s1084_s25 = int_to_ptr.vmem [resolvable:$false] %s1083_s25 }
 0x2c6   : > { %s1085_s14 = scalar_lea.vmem %s1084_s25, 256  ;;  %p1086_p11 = scmp.lt.s32.totalorder %s1527_s13, %s1084_s25 }
 0x2c7   : > { %p1081_p5 = pnand %p1080_p2, %p1634_p1  ;;  %p1087_p4 = scmp.lt.s32.totalorder %s1085_s14, %s1079_s7 }
 0x2c9   : > { %p1082_p9 = pneg %p1081_p5  ;;  %p1088_p8 = por %p1087_p4, %p1086_p11 }
 0x2cb   : > { %p1089_p6 = pnand %p1088_p8, %p1082_p9 }
 0x387   : > { %v550_v18 = vpop.f32.mrb[0].mxu1 }
 0x388   : > { %554 = vst.msk [vmem:[%s376_s8] sm:$0xff] %vm388_vm1, %v550_v18  ;;  %v822_v19 = vpop.f32.mrb[1].mxu1 }
 0x389   : > { %1092 = shalt.err (!%p1089_p6)
}
 0x38a   : > { %s1093_s28 = scalar_lea.hbm %s1525_s29, 128  ;;  %s1097_s20 = scalar_lea.hbm %s1584_s4, 512 }
 0x38b   : > { %p1094_p10 = scmp.ne.s32.totalorder %s1525_s29, %s1093_s28  ;;  %p1098_p12 = scmp.lt.u32.totalorder %s1525_s29, %s1584_s4 }
 0x38c   : > { %p1099_p13 = scmp.lt.u32.totalorder %s1097_s20, %s1093_s28  ;;  %p1101_p2 = scmp.lt.u32.totalorder %s1093_s28, %s1525_s29 }
 0x38d   : > { %p1095_p3 = pnand %p1094_p10, %p1634_p1 }
 0x38e   : > { %p1100_p0 = por %p1099_p13, %p1098_p12 }
 0x38f   : > { %p1096_p7 = pneg %p1095_p3 }
 0x390   : > { %p1102_p5 = por %p1101_p2, %p1100_p0 }
 0x392   : > { %p1103_p9 = pnand %p1102_p5, %p1096_p7 }
 0x394   : > { %1106 = shalt.err (!%p1103_p9)
}
 0x395   : > { %833 = dma.vmem_to_hbm [thread:$0]  (%p1634_p1), %s1527_s13, 128, %s1525_s29, %s556_s24  }
 0x396 PF: > { %s1635_s21 = sld [smem:[#allocation22_spill]]  ;;  %s1636_s6 = sld [smem:[#allocation18_spill]] }
 0x397   : > { %s1637_s11 = sld [smem:[#allocation26_spill]] }
 0x39c   : > { %p861_p11 = scmp.ge.s32.totalorder %s1635_s21, 2  ;;  %s605_s1 = sand.u32 1, %s1636_s6  }
 0x39d   : > { %p1638_p4 = scmp.ne.s32.totalorder %s1637_s11, 0  ;;  %s606_s23 = scalar_lea.sflag [#allocation4], %s605_s1 }
 0x39f   : > { %p852_p8 = pnand %p861_p11, %p1638_p4 }
 0x3a1   : > { %1152 = dma.done.wait (!%p852_p8), %s606_s23, 128  }
 0x3a2   : > { %1154 = vsyncadd (!%p852_p8), %s606_s23, 4294967168  ;;  %s615_s10 = scalar_lea.sflag [#allocation12], %s605_s1 }
 0x3a3   : > { %1156 = dma.done.wait (!%p852_p8), %s615_s10, 128  }
 0x3a4   : > { %1158 = vsyncadd (!%p852_p8), %s615_s10, 4294967168  ;;  %s29_s25 = sadd.s32 1, %s1635_s21   ;;  %s1639_s17 = sld [smem:[#allocation19_spill]] }
 0x3a5   : > { %p26_p6 = scmp.ge.s32.totalorder %s29_s25, 6   ;;  %s1640_s20 = sld [smem:[#allocation25_spill]] }
 0x3a6   : > { %s1641_s21 = sld [smem:[#allocation20_spill]]  ;;  %s1642_s22 = sld [smem:[#allocation21_spill]] }
 0x3a7   : > { %s1643_s23 = sld [smem:[#allocation23_spill]]  ;;  %s1644_s24 = sld [smem:[#allocation24_spill]] }
 0x3a8   : > { %s1645_s18 = smov %s1165_s19  ;;  %28 = sbr.rel (!%p26_p6) target bundleno = 14 (0xe), region = 127 }
 0x3aa   : > { %s1646_s19 = smov %s1639_s17 }
 0x3af   :  { %620 = vsyncpa [#allocation3], 1 }
 0x3b0   :  { %622 = vsyncpa [#allocation3 + $0x1], 1 }
 0x3b1   :  { %623 = vsyncpa [#allocation6], 1 }
 0x3b2   :  { %625 = vsyncpa [#allocation6 + $0x1], 1 }
 0x3b3   :  { %626 = vsyncpa [#allocation9], 1 }
 0x3b4   :  { %627 = vsyncpa [#allocation4], 1 }
 0x3b5   :  { %629 = vsyncpa [#allocation4 + $0x1], 1 }
 0x3b6   :  { %630 = vsyncpa [#allocation12], 1 }
 0x3b7   :  { %632 = vsyncpa [#allocation12 + $0x1], 1 }

</bundles_post_ra>
